<compile_context>
chip_gen: v5e
topology: v5e:2x2
jax: 0.10.0
libtpu: 0.0.40
codegen_flags: <defaults>
</compile_context>

<pallas_src>
import functools
import math

import jax
import jax.numpy as jnp
from jax.experimental import pallas as pl
from jax.experimental.pallas import tpu as pltpu

_S = 0.8                              # ReflectSoft.s
_BIAS = 2.0 - math.sqrt(3.0)          # bias used in forward()
_S_OVER_6 = _S / 6.0
_S_2LOG1PB = _S * 2.0 * math.log(1.0 + _BIAS)

_LANES = 128
_CHUNK_ROWS = 1024                    # compute granularity inside one DMA block
_TARGET_BLOCK_BYTES = 4 * 1024 * 1024 # ~4 MiB DMA blocks (per in/out buffer)
_MIN_GRID_STEPS = 8                   # give v7x's 2 TCs several blocks each
_VMEM_LIMIT = 32 * 1024 * 1024        # explicit limit, safe on v5e/v6e/v7x


def _reflect_soft_kernel(x_ref, o_ref, *, chunk_rows, n_chunks):
    """Elementwise ReflectSoft on one (tile_rows, 128) block.

    The block is processed in `n_chunks` chunks of `chunk_rows` rows so the f32
    temporaries stay small regardless of DMA-block size; pl.loop bounds their
    live ranges to a single chunk.
    """
    @pl.loop(0, n_chunks)
    def _(c):
        r = pl.multiple_of(c * chunk_rows, chunk_rows)
        # Upcast to f32 for compute (v5e has no bf16 VPU/EUP; keeps precision).
        x = x_ref[pl.ds(r, chunk_rows), :].astype(jnp.float32)
        # Exactly 2 EUP pushes / element (exp, log); the rest is cheap VALU work.
        e = jnp.exp(-jnp.abs(x))
        s_l = _S * jnp.log(1.0 + _BIAS * e)          # shared by both branches
        pos = x * x * _S_OVER_6 - s_l + _S_2LOG1PB
        o_ref[pl.ds(r, chunk_rows), :] = jnp.where(x > 0.0, pos, s_l).astype(o_ref.dtype)


def _reflect_soft_jnp(x, out_dtype):
    """Plain-JAX path for tiny inputs / the <128-element unaligned tail."""
    xf = x.astype(jnp.float32)
    e = jnp.exp(-jnp.abs(xf))
    s_l = _S * jnp.log(1.0 + _BIAS * e)
    pos = xf * xf * _S_OVER_6 - s_l + _S_2LOG1PB
    return jnp.where(xf > 0.0, pos, s_l).astype(out_dtype)


def _reflect_soft_2d(x2d, sub_mult):
    """Pallas call on a lane-dense (rows, 128) view; rows >= sub_mult."""
    rows = x2d.shape[0]
    dtype = x2d.dtype
    itemsize = jnp.dtype(dtype).itemsize

    # Compute-chunk granularity: multiple of the sublane packing, <= rows, so the
    # block row-dim is always a legal (8,128)-aligned size and never exceeds rows.
    chunk_rows = min(_CHUNK_ROWS, (rows // sub_mult) * sub_mult)
    total_chunks = pl.cdiv(rows, chunk_rows)

    # Chunks per DMA block: cap block bytes at ~4 MiB, but keep the grid at
    # >= _MIN_GRID_STEPS steps (when possible) so both v7x TCs get work.
    max_cpt = max(1, _TARGET_BLOCK_BYTES // (chunk_rows * _LANES * itemsize))
    cpt = max(1, min(max_cpt, total_chunks // _MIN_GRID_STEPS))
    tile_rows = cpt * chunk_rows
    grid = (pl.cdiv(rows, tile_rows),)

    n = rows * _LANES
    cost = pl.CostEstimate(flops=11 * n, transcendentals=2 * n,
                           bytes_accessed=2 * n * itemsize)

    kernel = functools.partial(_reflect_soft_kernel,
                               chunk_rows=chunk_rows, n_chunks=cpt)
    return pl.pallas_call(
        kernel,
        out_shape=jax.ShapeDtypeStruct((rows, _LANES), dtype),
        grid_spec=pltpu.PrefetchScalarGridSpec(
            num_scalar_prefetch=0,
            grid=grid,
            in_specs=[pl.BlockSpec((tile_rows, _LANES), lambda i: (i, 0))],
            out_specs=pl.BlockSpec((tile_rows, _LANES), lambda i: (i, 0)),
        ),
        compiler_params=pltpu.CompilerParams(
            dimension_semantics=("parallel",),
            vmem_limit_bytes=_VMEM_LIMIT,
        ),
        cost_estimate=cost,
    )(x2d)


@jax.jit
def reflect_soft(x):
    """Elementwise ReflectSoft activation; accepts any shape / float dtype."""
    orig_shape, orig_dtype = x.shape, x.dtype
    n = x.size
    if n == 0:
        return x

    itemsize = jnp.dtype(orig_dtype).itemsize
    sub_mult = 8 * max(1, 4 // itemsize)      # 8 rows f32, 16 rows bf16, ...
    min_elems = sub_mult * _LANES

    xf = x.reshape(-1)
    rem = n % _LANES
    n_main = n - rem

    if n_main < min_elems:
        # Too small for even one minimal (sub_mult, 128) tile: plain JAX.
        return _reflect_soft_jnp(xf, orig_dtype).reshape(orig_shape)

    if rem == 0:
        out2d = _reflect_soft_2d(xf.reshape(-1, _LANES), sub_mult)
        return out2d.reshape(orig_shape)

    # Unaligned size: kernel on the 128-aligned prefix, plain JAX on the
    # <128-element tail (no whole-tensor pad / slice round trips).
    out_main = _reflect_soft_2d(xf[:n_main].reshape(-1, _LANES), sub_mult)
    out_tail = _reflect_soft_jnp(xf[n_main:], orig_dtype)
    return jnp.concatenate([out_main.reshape(-1), out_tail]).reshape(orig_shape)


def _reflect_soft_ref(x):
    """Pure-JAX transcription of the PyTorch forward (literal formula)."""
    x = x.astype(jnp.float32)
    pos = (x * (x + 6.0) - 6.0 * jnp.log(jnp.exp(x) + _BIAS)) / 6.0 \
        + 2.0 * math.log(1.0 + _BIAS)
    neg = jnp.log(1.0 + jnp.exp(x + math.log(_BIAS)))
    return _S * jnp.where(x > 0.0, pos, neg)


# TODO(synk): dforward/d2forward/d3forward (analytic derivative helpers) are not part
# of the module's forward pass and are not ported here.

if __name__ == "__main__":
    key = jax.random.PRNGKey(0)
    k0, k1, k2, k3 = jax.random.split(key, 4)

    # Main test: small NCHW conv-feature-map-style input (f32), 128-aligned.
    x = jax.random.normal(k0, (2, 4, 16, 16), dtype=jnp.float32) * 2.0
    y = jax.block_until_ready(reflect_soft(x))
    assert y.shape == x.shape and y.dtype == x.dtype
    assert jnp.allclose(y, _reflect_soft_ref(x), atol=1e-5, rtol=1e-5), \
        "f32 mismatch vs reference"

    # Odd size: exercises the 128-aligned-prefix + plain-JAX-tail path.
    x_odd = jax.random.normal(k1, (2, 3, 33, 35), dtype=jnp.float32) * 3.0
    y_odd = jax.block_until_ready(reflect_soft(x_odd))
    assert y_odd.shape == x_odd.shape
    assert jnp.allclose(y_odd, _reflect_soft_ref(x_odd), atol=1e-5, rtol=1e-5), \
        "odd-shape mismatch vs reference"

    # Multi-step grid with a partial last block (rows = 2080, tile = 1024).
    x_big = jax.random.normal(k2, (4, 16, 64, 65), dtype=jnp.float32) * 2.0
    y_big = jax.block_until_ready(reflect_soft(x_big))
    assert jnp.allclose(y_big, _reflect_soft_ref(x_big), atol=1e-5, rtol=1e-5), \
        "multi-block mismatch vs reference"

    # Larger input exercising multi-chunk blocks + >=8 grid steps
    # (rows = 16384 -> 2 chunks/block, grid = 8).
    x_huge = jax.random.normal(k3, (8, 8, 128, 256), dtype=jnp.float32) * 2.0
    y_huge = jax.block_until_ready(reflect_soft(x_huge))
    assert jnp.allclose(y_huge, _reflect_soft_ref(x_huge), atol=1e-5, rtol=1e-5), \
        "chunked-block mismatch vs reference"

    # bf16 I/O path (f32 compute inside the kernel, bf16 HBM traffic).
    x_bf16 = x.astype(jnp.bfloat16)
    y_bf16 = jax.block_until_ready(reflect_soft(x_bf16))
    assert y_bf16.dtype == jnp.bfloat16 and y_bf16.shape == x.shape
    ref_bf16 = _reflect_soft_ref(x_bf16.astype(jnp.float32))
    assert jnp.allclose(y_bf16.astype(jnp.float32), ref_bf16,
                        atol=2e-2, rtol=2e-2), "bf16 mismatch vs reference"

    # Tiny input (plain-JAX fallback path).
    x_tiny = jax.random.normal(k0, (3, 5), dtype=jnp.float32)
    y_tiny = jax.block_until_ready(reflect_soft(x_tiny))
    assert y_tiny.shape == x_tiny.shape
    assert jnp.allclose(y_tiny, _reflect_soft_ref(x_tiny), atol=1e-5, rtol=1e-5), \
        "tiny-input mismatch vs reference"

    print("KERNEL_OK")
</pallas_src>

<mosaic_0001>
module attributes {stable_mosaic.version = 11 : i64} {
  func.func @_reflect_soft_kernel(%arg0: i32, %arg1: memref<16x128xf32, #tpu.memory_space<vmem>>, %arg2: memref<16x128xf32, #tpu.memory_space<vmem>>) attributes {dimension_semantics = [#tpu.dimension_semantics<parallel>], iteration_bounds = array<i64: 1>, scalar_prefetch = 0 : i64, scratch_operands = 0 : i64, tpu.core_type = #tpu.core_type<tc>, window_params = [{transform_indices = @transform_0, window_bounds = array<i64: 16, 128>}, {transform_indices = @transform_1, window_bounds = array<i64: 16, 128>}]} {
    %c0_i32 = arith.constant 0 : i32
    %c1_i32 = arith.constant 1 : i32
    %0 = arith.muli %c0_i32, %c1_i32 : i32
    %c0_i32_0 = arith.constant 0 : i32
    %1 = arith.addi %c0_i32_0, %0 : i32
    %c16_i32 = arith.constant 16 : i32
    %2 = arith.muli %1, %c16_i32 : i32
    %3 = tpu.assume_multiple %2, 16 : i32
    %4 = arith.index_cast %3 : i32 to index
    %c0 = arith.constant 0 : index
    %5 = vector.load %arg1[%4, %c0] : memref<16x128xf32, #tpu.memory_space<vmem>>, vector<16x128xf32>
    %6 = math.absf %5 : vector<16x128xf32>
    %cst = arith.constant 0.000000e+00 : f32
    %7 = vector.broadcast %cst : f32 to vector<16x128xf32>
    %8 = arith.subf %7, %6 : vector<16x128xf32>
    %9 = math.exp %8 : vector<16x128xf32>
    %cst_1 = arith.constant 0.267949194 : f32
    %10 = vector.broadcast %cst_1 : f32 to vector<16x128xf32>
    %11 = arith.mulf %10, %9 : vector<16x128xf32>
    %cst_2 = arith.constant 1.000000e+00 : f32
    %12 = vector.broadcast %cst_2 : f32 to vector<16x128xf32>
    %13 = arith.addf %12, %11 : vector<16x128xf32>
    %14 = math.log %13 : vector<16x128xf32>
    %cst_3 = arith.constant 8.000000e-01 : f32
    %15 = vector.broadcast %cst_3 : f32 to vector<16x128xf32>
    %16 = arith.mulf %15, %14 : vector<16x128xf32>
    %17 = arith.mulf %5, %5 : vector<16x128xf32>
    %cst_4 = arith.constant 0.13333334 : f32
    %18 = vector.broadcast %cst_4 : f32 to vector<16x128xf32>
    %19 = arith.mulf %17, %18 : vector<16x128xf32>
    %20 = arith.subf %19, %16 : vector<16x128xf32>
    %cst_5 = arith.constant 0.379841268 : f32
    %21 = vector.broadcast %cst_5 : f32 to vector<16x128xf32>
    %22 = arith.addf %20, %21 : vector<16x128xf32>
    %cst_6 = arith.constant 0.000000e+00 : f32
    %23 = vector.broadcast %cst_6 : f32 to vector<16x128xf32>
    %24 = arith.cmpf ogt, %5, %23 : vector<16x128xf32>
    %25 = arith.select %24, %22, %16 : vector<16x128xi1>, vector<16x128xf32>
    %26 = arith.index_cast %3 : i32 to index
    %c0_7 = arith.constant 0 : index
    %27 = vector.load %arg2[%26, %c0_7] : memref<16x128xf32, #tpu.memory_space<vmem>>, vector<16x128xf32>
    tpu.vector_store %arg2[%26, %c0_7], %25 {strides = array<i32>} : memref<16x128xf32, #tpu.memory_space<vmem>>, vector<16x128xf32>,
    %c1_i32_8 = arith.constant 1 : i32
    return
  }
  func.func @transform_0(%arg0: i32) -> (i32, i32) {
    %c0_i32 = arith.constant 0 : i32
    %c0_i32_0 = arith.constant 0 : i32
    return %arg0, %c0_i32 : i32, i32
  }
  func.func @transform_1(%arg0: i32) -> (i32, i32) {
    %c0_i32 = arith.constant 0 : i32
    %c0_i32_0 = arith.constant 0 : i32
    return %arg0, %c0_i32 : i32, i32
  }
}

</mosaic_0001>

<bundles_post_ra>
// kernel: reflect_soft.1
= control target key start
LH: loop header
LB: loop body
LE: loop exit
PB: predicated region body
PF: predicated region fallthrough
CT: control target
= control target key end

     0   :  { %s76_s0 = inlined_call_operand.vmem [shape: f32[16,128], index: 0, kind: input, shape index: {}]   ;;  %s77_s1 = inlined_call_operand.vmem [shape: f32[16,128], index: 1, kind: output, shape index: {}]  }
   0x1   :  { %v8_v0 = vld [vmem:[%s76_s0] sm:$0xff]  ;;  %v9_v1 = vld [vmem:[%s76_s0 + $0x8] sm:$0xff] }
   0x2   :  { %v10_v2 = vand.u32 2147483647, %v8_v0  ;;  %v11_v3 = vand.u32 2147483647, %v9_v1  ;;  %v28_v14 = vmul.f32 %v8_v0, %v8_v0  ;;  %v29_v15 = vmul.f32 %v9_v1, %v9_v1 }
   0x3   :  { %vm36_vm0 = vcmp.gt.f32.partialorder %v8_v0, 0.0  ;;  %vm37_vm1 = vcmp.gt.f32.partialorder %v9_v1, 0.0 }
   0x4   :  { %v12_v4 = vsub.f32 0.0, %v10_v2  ;;  %v13_v5 = vsub.f32 0.0, %v11_v3  ;;  %v30_v19 = vmul.f32 0.13333334, %v28_v14  ;;  %v31_v21 = vmul.f32 0.13333334, %v29_v15 }
   0x6   :  { %v14_v6 = vmul.f32 1.442695, %v12_v4  ;;  %v16_v7 = vmul.f32 1.442695, %v13_v5 }
   0x8   :  { %46 = vpow2.f32 %v14_v6 }
   0x9   :  { %48 = vpow2.f32 %v16_v7 }
   0xe   :  { %v47_v8 = vpop.eup %46 }
   0xf   :  { %v49_v9 = vpop.eup %48  ;;  %v18_v10 = vmul.f32 0.2679492, %v47_v8 }
  0x10   :  { %v19_v11 = vmul.f32 0.2679492, %v49_v9 }
  0x11   :  { %v20_v12 = vadd.f32 1.0, %v18_v10 }
  0x12   :  { %v21_v13 = vadd.f32 1.0, %v19_v11 }
  0x13   :  { %50 = vlog2.f32 %v20_v12 }
  0x14   :  { %52 = vlog2.f32 %v21_v13 }
  0x19   :  { %v51_v16 = vpop.eup %50 }
  0x1a   :  { %v53_v17 = vpop.eup %52  ;;  %v23_v18 = vmul.f32 0.6931472, %v51_v16 }
  0x1b   :  { %v25_v20 = vmul.f32 0.6931472, %v53_v17 }
  0x1c   :  { %v26_v22 = vmul.f32 0.8, %v23_v18 }
  0x1d   :  { %v27_v23 = vmul.f32 0.8, %v25_v20 }
  0x1e   :  { %v32_v24 = vsub.f32 %v30_v19, %v26_v22 }
  0x1f   :  { %v33_v25 = vsub.f32 %v31_v21, %v27_v23 }
  0x20   :  { %v34_v26 = vadd.f32 0.37984127, %v32_v24 }
  0x21   :  { %v35_v27 = vadd.f32 0.37984127, %v33_v25 }
  0x22   :  { %v38_v28 = vsel %vm36_vm0, %v34_v26, %v26_v22 }
  0x23   :  { %40 = vst [vmem:[%s77_s1] sm:$0xff] %v38_v28  ;;  %v39_v29 = vsel %vm37_vm1, %v35_v27, %v27_v23 }
  0x24   :  { %41 = vst [vmem:[%s77_s1 + $0x8] sm:$0xff] %v39_v29 }

</bundles_post_ra>
